<compile_context>
chip_gen: v7x
topology: tpu7x:2x2x1
jax: 0.10.0
libtpu: 0.0.40
codegen_flags: <defaults>
</compile_context>

<pallas_src>
import jax
import jax.numpy as jnp
from jax import lax
from jax.experimental import pallas as pl
from jax.experimental.pallas import tpu as pltpu


def primarycaps_kernel(xcol_ref, w_ref, bias_ref, bcap_ref, o_ref):
    # xcol_ref: [1, C_in*K, TL]   im2col slab for one batch / L'-tile (lane = L')
    # w_ref   : [O, C_in*K]       conv weight, O = out_caps*out_dim
    # bias_ref: [O, 1]            conv bias
    # bcap_ref: [O, O]            block-diagonal capsule-membership matrix
    # o_ref   : [1, O, TL]        squashed capsule output (lane-dense on L')
    x = xcol_ref[0]                                                   # [CK, TL]

    # Conv1d as a single MXU matmul; output tile is [O, TL], lane-dense.
    y = jnp.dot(w_ref[...], x,
                preferred_element_type=jnp.float32) + bias_ref[...]   # [O, TL]

    # Per-capsule squared norm, broadcast back to every channel of the capsule,
    # in one well-shaped [O, O] @ [O, TL] matmul (Bcap is block-diagonal 0/1).
    sq_norm = jnp.dot(bcap_ref[...], y * y,
                      preferred_element_type=jnp.float32)             # [O, TL]

    # squash scale = norm / (1 + norm) / sqrt(norm + 1e-8)
    # reciprocal + rsqrt run on the EUP; elementwise math stays f32.
    scale = (sq_norm
             * pl.reciprocal(1.0 + sq_norm, approx=True)
             * lax.rsqrt(sq_norm + 1e-8))                             # [O, TL]

    o_ref[0] = (scale * y).astype(o_ref.dtype)


def primary_caps_forward(x, weight, bias, out_caps, out_dim,
                         kernel_size=3, stride=1, tl_max=512):
    """x: [B, C_in, L] f32; weight: [O, C_in, K]; bias: [O].

    Returns [B, out_caps, out_dim, L'] with L' = (L - K) // stride + 1.
    """
    B, C_in, L = x.shape
    O, _, K = weight.shape
    assert O == out_caps * out_dim and K == kernel_size
    Lp = (L - K) // stride + 1
    CK = C_in * K

    # im2col in transposed layout (glue, plain JAX):
    #   x_col_t[b, c*K + k, t] = x[b, c, stride*t + k]
    cols = jnp.stack(
        [x[:, :, k: k + stride * Lp: stride] for k in range(K)], axis=2
    )                                                   # [B, C_in, K, L']
    x_col_t = cols.reshape(B, CK, Lp)                   # [B, C_in*K, L']

    # Lane tiling over L': one full-extent tile when small, else 128-aligned
    # tiles (padding columns are zeros -> squash stays finite; sliced off below).
    if Lp <= tl_max:
        TL, Lp_pad = Lp, Lp
    else:
        TL = tl_max
        Lp_pad = pl.cdiv(Lp, TL) * TL
        x_col_t = jnp.pad(x_col_t, ((0, 0), (0, 0), (0, Lp_pad - Lp)))

    w2d = weight.reshape(O, CK)                         # [O, C_in*K]
    bias2d = bias.reshape(O, 1)

    # Block-diagonal capsule-membership matrix: Bcap[o, o'] = 1 iff same capsule.
    cap_id = jnp.arange(O) // out_dim
    bcap = (cap_id[:, None] == cap_id[None, :]).astype(jnp.float32)   # [O, O]

    n_l = Lp_pad // TL
    grid = (B, n_l)

    cost = pl.CostEstimate(
        flops=2 * B * Lp_pad * O * (CK + O) + 6 * B * Lp_pad * O,
        transcendentals=2 * B * Lp_pad * O,
        bytes_accessed=4 * (B * CK * Lp_pad + B * O * Lp_pad
                            + O * CK + O + O * O),
    )

    y = pl.pallas_call(
        primarycaps_kernel,
        out_shape=jax.ShapeDtypeStruct((B, O, Lp_pad), jnp.float32),
        grid=grid,
        in_specs=[
            pl.BlockSpec((1, CK, TL), lambda b, t: (b, 0, t)),   # x_col_t tile
            pl.BlockSpec((O, CK), lambda b, t: (0, 0)),          # weight (pinned)
            pl.BlockSpec((O, 1), lambda b, t: (0, 0)),           # bias   (pinned)
            pl.BlockSpec((O, O), lambda b, t: (0, 0)),           # Bcap   (pinned)
        ],
        out_specs=pl.BlockSpec((1, O, TL), lambda b, t: (b, 0, t)),
        compiler_params=pltpu.CompilerParams(
            dimension_semantics=("parallel", "parallel")),
        cost_estimate=cost,
    )(x_col_t, w2d, bias2d, bcap)

    # [B, O, L'] -> [B, out_caps, out_dim, L'] : pure reshape, no transpose.
    out = y[:, :, :Lp].reshape(B, out_caps, out_dim, Lp)
    return out


def reference_forward(x, weight, bias, out_caps, out_dim, kernel_size=3, stride=1):
    """Pure-JAX reference matching the PyTorch module semantics."""
    out = lax.conv_general_dilated(
        x, weight, window_strides=(stride,), padding="VALID",
        dimension_numbers=("NCH", "OIH", "NCH"))
    out = out + bias[None, :, None]
    B = x.shape[0]
    Lp = out.shape[2]
    out = out.reshape(B, out_caps, out_dim, Lp)
    sq = jnp.sum(out ** 2, axis=-2, keepdims=True)
    scale = sq / (1.0 + sq)
    return scale * out / jnp.sqrt(sq + 1e-8)


if __name__ == "__main__":
    # Small shapes consistent with the module's forward:
    #   x: [batch=2, in_channels=4, seq_len=16]
    #   out_caps=8, out_dim=16, kernel_size=3, stride=1 -> out seq len 14
    B, C_in, L = 2, 4, 16
    out_caps, out_dim, K, stride = 8, 16, 3, 1
    O = out_caps * out_dim

    key = jax.random.PRNGKey(0)
    kx, kw, kb = jax.random.split(key, 3)
    x = jax.random.normal(kx, (B, C_in, L), dtype=jnp.float32)
    weight = 0.1 * jax.random.normal(kw, (O, C_in, K), dtype=jnp.float32)
    bias = 0.01 * jax.random.normal(kb, (O,), dtype=jnp.float32)

    out = primary_caps_forward(x, weight, bias, out_caps, out_dim, K, stride)
    out = jax.block_until_ready(out)

    ref = reference_forward(x, weight, bias, out_caps, out_dim, K, stride)
    assert out.shape == (B, out_caps, out_dim, (L - K) // stride + 1)
    # Tolerance accounts for the EUP approximate reciprocal in the squash scale
    # (structural errors would show up at O(1e-1), far above this threshold).
    assert jnp.allclose(out, ref, atol=2e-3, rtol=2e-3), \
        f"max abs err = {jnp.max(jnp.abs(out - ref))}"

    print("KERNEL_OK")
</pallas_src>

<mosaic_0001>
module attributes {stable_mosaic.version = 11 : i64} {
  func.func @primarycaps_kernel(%arg0: i32, %arg1: i32, %arg2: memref<1x12x14xf32, #tpu.memory_space<vmem>>, %arg3: memref<128x12xf32, #tpu.memory_space<vmem>>, %arg4: memref<128x1xf32, #tpu.memory_space<vmem>>, %arg5: memref<128x128xf32, #tpu.memory_space<vmem>>, %arg6: memref<1x128x14xf32, #tpu.memory_space<vmem>>) attributes {dimension_semantics = [#tpu.dimension_semantics<parallel>, #tpu.dimension_semantics<parallel>], iteration_bounds = array<i64: 2, 1>, scalar_prefetch = 0 : i64, scratch_operands = 0 : i64, tpu.core_type = #tpu.core_type<tc>, window_params = [{transform_indices = @transform_0, window_bounds = array<i64: 1, 12, 14>}, {pipeline_mode = #tpu.pipeline_mode<synchronous>, transform_indices = @transform_1, window_bounds = array<i64: 128, 12>}, {pipeline_mode = #tpu.pipeline_mode<synchronous>, transform_indices = @transform_2, window_bounds = array<i64: 128, 1>}, {pipeline_mode = #tpu.pipeline_mode<synchronous>, transform_indices = @transform_3, window_bounds = array<i64: 128, 128>}, {transform_indices = @transform_4, window_bounds = array<i64: 1, 128, 14>}]} {
    %c0 = arith.constant 0 : index
    %c0_0 = arith.constant 0 : index
    %c0_1 = arith.constant 0 : index
    %0 = vector.load %arg2[%c0, %c0_0, %c0_1] : memref<1x12x14xf32, #tpu.memory_space<vmem>>, vector<1x12x14xf32>
    %1 = vector.shape_cast %0 : vector<1x12x14xf32> to vector<12x14xf32>
    %c0_2 = arith.constant 0 : index
    %c0_3 = arith.constant 0 : index
    %2 = vector.load %arg3[%c0_2, %c0_3] : memref<128x12xf32, #tpu.memory_space<vmem>>, vector<128x12xf32>
    %cst = arith.constant dense<0.000000e+00> : vector<128x14xf32>
    %3 = tpu.matmul %2, %1, %cst {dimension_numbers = #tpu.dot_dimension_numbers<[1], [0], [0], [1], [0, 0, 1, 1], [], []>} : vector<128x12xf32>, vector<12x14xf32>, vector<128x14xf32> -> vector<128x14xf32>
    %c0_4 = arith.constant 0 : index
    %c0_5 = arith.constant 0 : index
    %4 = vector.load %arg4[%c0_4, %c0_5] : memref<128x1xf32, #tpu.memory_space<vmem>>, vector<128x1xf32>
    %5 = vector.broadcast %4 : vector<128x1xf32> to vector<128x14xf32>
    %6 = arith.addf %3, %5 : vector<128x14xf32>
    %c0_6 = arith.constant 0 : index
    %c0_7 = arith.constant 0 : index
    %7 = vector.load %arg5[%c0_6, %c0_7] : memref<128x128xf32, #tpu.memory_space<vmem>>, vector<128x128xf32>
    %8 = arith.mulf %6, %6 : vector<128x14xf32>
    %cst_8 = arith.constant dense<0.000000e+00> : vector<128x14xf32>
    %9 = tpu.matmul %7, %8, %cst_8 {dimension_numbers = #tpu.dot_dimension_numbers<[1], [0], [0], [1], [0, 0, 1, 1], [], []>} : vector<128x128xf32>, vector<128x14xf32>, vector<128x14xf32> -> vector<128x14xf32>
    %cst_9 = arith.constant 1.000000e+00 : f32
    %10 = vector.broadcast %cst_9 : f32 to vector<128x14xf32>
    %11 = arith.addf %10, %9 : vector<128x14xf32>
    %12 = tpu.reciprocal %11 {approx = true} : vector<128x14xf32> -> vector<128x14xf32>
    %13 = arith.mulf %9, %12 : vector<128x14xf32>
    %cst_10 = arith.constant 9.99999993E-9 : f32
    %14 = vector.broadcast %cst_10 : f32 to vector<128x14xf32>
    %15 = arith.addf %9, %14 : vector<128x14xf32>
    %16 = math.rsqrt %15 : vector<128x14xf32>
    %17 = arith.mulf %13, %16 : vector<128x14xf32>
    %18 = arith.mulf %17, %6 : vector<128x14xf32>
    %c0_11 = arith.constant 0 : index
    %c0_12 = arith.constant 0 : index
    %c0_13 = arith.constant 0 : index
    %19 = vector.load %arg6[%c0_11, %c0_12, %c0_13] : memref<1x128x14xf32, #tpu.memory_space<vmem>>, vector<1x128x14xf32>
    %20 = vector.shape_cast %19 : vector<1x128x14xf32> to vector<128x14xf32>
    %21 = vector.shape_cast %18 : vector<128x14xf32> to vector<1x128x14xf32>
    tpu.vector_store %arg6[%c0_11, %c0_12, %c0_13], %21 {strides = array<i32>} : memref<1x128x14xf32, #tpu.memory_space<vmem>>, vector<1x128x14xf32>,
    return
  }
  func.func @transform_0(%arg0: i32, %arg1: i32) -> (i32, i32, i32) {
    %c0_i32 = arith.constant 0 : i32
    %c0_i32_0 = arith.constant 0 : i32
    return %arg0, %c0_i32, %arg1 : i32, i32, i32
  }
  func.func @transform_1(%arg0: i32, %arg1: i32) -> (i32, i32) {
    %c0_i32 = arith.constant 0 : i32
    %c0_i32_0 = arith.constant 0 : i32
    %c0_i32_1 = arith.constant 0 : i32
    return %c0_i32, %c0_i32_0 : i32, i32
  }
  func.func @transform_2(%arg0: i32, %arg1: i32) -> (i32, i32) {
    %c0_i32 = arith.constant 0 : i32
    %c0_i32_0 = arith.constant 0 : i32
    %c0_i32_1 = arith.constant 0 : i32
    return %c0_i32, %c0_i32_0 : i32, i32
  }
  func.func @transform_3(%arg0: i32, %arg1: i32) -> (i32, i32) {
    %c0_i32 = arith.constant 0 : i32
    %c0_i32_0 = arith.constant 0 : i32
    %c0_i32_1 = arith.constant 0 : i32
    return %c0_i32, %c0_i32_0 : i32, i32
  }
  func.func @transform_4(%arg0: i32, %arg1: i32) -> (i32, i32, i32) {
    %c0_i32 = arith.constant 0 : i32
    %c0_i32_0 = arith.constant 0 : i32
    return %arg0, %c0_i32, %arg1 : i32, i32, i32
  }
}

</mosaic_0001>

<bundles_post_ra>
// kernel: tpu_custom_call.1
= control target key start
LH: loop header
LB: loop body
LE: loop exit
PB: predicated region body
PF: predicated region fallthrough
CT: control target
= control target key end

     0   :  { %s1291_s15 = smov 0   ;;  %s1293_s16 = smov 0   ;;  %s1667_s0 = inlined_call_operand.vmem [shape: f32[2,12,14], index: 0, kind: input, shape index: {}]   ;;  %s1668_s1 = inlined_call_operand.vmem [shape: f32[128,12], index: 1, kind: input, shape index: {}]   ;;  %s1669_s2 = inlined_call_operand.vmem [shape: f32[128,1], index: 2, kind: input, shape index: {}]   ;;  %s1670_s3 = inlined_call_operand.vmem [shape: f32[128,128], index: 3, kind: input, shape index: {}]   ;;  %s1671_s4 = inlined_call_operand.vmem [shape: f32[2,128,14], index: 4, kind: output, shape index: {}]  }
   0x1   :  { %s1295_s17 = smov 0  }
   0x2 LB: > { %s26_s18 = sadd.s32 1, %s1258_s16  ;;  %p934_p0 = scmp.ge.s32.totalorder %s1262_s17, 1  ;;  %s1262_s17 = sphi %s1295_s17, %s14_s17   ;;  %s1258_s16 = sphi %s1293_s16, %s1673_s16   ;;  %s1254_s15 = sphi %s1291_s15, %s1672_s15  }
   0x3   : > { %p28_p1 = scmp.ge.s32.totalorder %s26_s18, 2  ;;  %p181_p2 = scmp.lt.s32.totalorder %s1262_s17, 3 }
   0x5   : > { %s1675_s18 = smov (%p28_p1, %s26_s18), 0  ;;  %p182_p3 = pnand %p934_p0, %p181_p2 }
   0x6   : > { %p213_p4 = scmp.lt.s32.totalorder (!%p182_p3), %s1254_s15, 1  ;;  %v231_v0 = vld [vmem:[%s1668_s1] sm:$0xff] (!%p182_p3)  ;;  %vm343_vm0 = vcmask (!%p182_p3), 97280   ;;  %vm392_vm1 = vcmask (!%p182_p3), 1043456   ;;  %v1264_v1 = vmov (!%p182_p3), 0   ;;  %vm1265_vm2 = vmmov (!%p182_p3), 1  }
   0x7   : > { %185 = sbr.rel (%p182_p3) target bundleno = 537 (0x219), region = 36  ;;  %1014 = vmatprep.mubr.msk.f32.mxu0 (!%p182_p3), %vm343_vm0, %v231_v0  ;;  %1174 = vset.pattern.permute.xlu0 (!%p182_p3), %v1264_v1  ;;  %vm1095_vm3 = vmpackc.low (!%p182_p3), %vm392_vm1, %vm1265_vm2  ;;  %v247_v4 = vld [vmem:[%s1669_s2] sm:$0xff] (!%p182_p3)  ;;  %v249_v6 = vld [vmem:[%s1669_s2 + $0x10] sm:$0xff] (!%p182_p3)  ;;  %vm830_vm4 = vcmask (!%p182_p3), 113664  }
   0x8   : > { %1175 = vset.pattern.permute.xlu1 (!%p182_p3), %v1264_v1  ;;  %265 = vperm.xlu0 (!%p182_p3), %1174, %v247_v4   ;;  %v248_v7 = vld [vmem:[%s1669_s2 + $0x8] sm:$0xff] (!%p182_p3)  ;;  %v250_v8 = vld [vmem:[%s1669_s2 + $0x18] sm:$0xff] (!%p182_p3)  ;;  %v233_v10 = vld [vmem:[%s1668_s1 + $0x10] sm:$0xff] (!%p182_p3) }
   0x9   : > { %275 = vperm.xlu1 (!%p182_p3), %1175, %v249_v6   ;;  %v232_v9 = vld [vmem:[%s1668_s1 + $0x8] sm:$0xff] (!%p182_p3)  ;;  %v251_v11 = vld [vmem:[%s1669_s2 + $0x20] sm:$0xff] (!%p182_p3)  ;;  %v234_v13 = vld [vmem:[%s1668_s1 + $0x18] sm:$0xff] (!%p182_p3) }
   0xa   : > { %v252_v12 = vld [vmem:[%s1669_s2 + $0x28] sm:$0xff] (!%p182_p3)  ;;  %v235_v14 = vld [vmem:[%s1668_s1 + $0x20] sm:$0xff] (!%p182_p3)  ;;  %v253_v15 = vld [vmem:[%s1669_s2 + $0x30] sm:$0xff] (!%p182_p3) }
   0xb   : > { %v254_v16 = vld [vmem:[%s1669_s2 + $0x38] sm:$0xff] (!%p182_p3)  ;;  %v236_v17 = vld [vmem:[%s1668_s1 + $0x28] sm:$0xff] (!%p182_p3)  ;;  %v237_v18 = vld [vmem:[%s1668_s1 + $0x30] sm:$0xff] (!%p182_p3) }
   0xc   : > { %270 = vperm.xlu0 (!%p182_p3), %1174, %v248_v7   ;;  %v255_v19 = vld [vmem:[%s1669_s2 + $0x40] sm:$0xff] (!%p182_p3)  ;;  %v256_v20 = vld [vmem:[%s1669_s2 + $0x48] sm:$0xff] (!%p182_p3)  ;;  %v238_v21 = vld [vmem:[%s1668_s1 + $0x38] sm:$0xff] (!%p182_p3) }
   0xd   : > { %280 = vperm.xlu1 (!%p182_p3), %1175, %v250_v8   ;;  %v239_v22 = vld [vmem:[%s1668_s1 + $0x40] sm:$0xff] (!%p182_p3)  ;;  %v257_v23 = vld [vmem:[%s1669_s2 + $0x50] sm:$0xff] (!%p182_p3)  ;;  %v258_v24 = vld [vmem:[%s1669_s2 + $0x58] sm:$0xff] (!%p182_p3) }
   0xe   : > { %s1677_s15 = smov (!%p213_p4, %s1254_s15), 1  ;;  %v240_v25 = vld [vmem:[%s1668_s1 + $0x48] sm:$0xff]  ;;  %v241_v26 = vld [vmem:[%s1668_s1 + $0x50] sm:$0xff]  ;;  %v259_v27 = vld [vmem:[%s1669_s2 + $0x60] sm:$0xff] }
   0xf   : > { %s958_s21 = sshll.u32 %s1677_s15, 4  ;;  %v260_v28 = vld [vmem:[%s1669_s2 + $0x68] sm:$0xff]  ;;  %v242_v29 = vld [vmem:[%s1668_s1 + $0x58] sm:$0xff]  ;;  %v243_v30 = vld [vmem:[%s1668_s1 + $0x60] sm:$0xff]  ;;  %s959_s5 = sshll.u32 %s1677_s15, 7 }
  0x10   : > { %s220_s24 = scalar_lea.vmem %s1667_s0, %s958_s21  ;;  %285 = vperm.xlu0 %1174, %v251_v11   ;;  %v261_v31 = vld [vmem:[%s1669_s2 + $0x70] sm:$0xff]  ;;  %v262_v32 = vld [vmem:[%s1669_s2 + $0x78] sm:$0xff]  ;;  %v244_v33 = vld [vmem:[%s1668_s1 + $0x68] sm:$0xff]  ;;  %s1579_s15 = scalar_lea.vmem %s1671_s4, %s959_s5 }
  0x11   : > { %v229_v2 = vld [vmem:[%s220_s24] sm:$0xff]  ;;  %v230_v3 = vld [vmem:[%s220_s24 + $0x8] sm:$0xf]  ;;  %290 = vperm.xlu1 %1175, %v252_v12   ;;  %v245_v34 = vld [vmem:[%s1668_s1 + $0x70] sm:$0xff] }
  0x12   : > { %v1094_v5 = vpack.c.bf16 %v230_v3, %v229_v2  ;;  %v246_v35 = vld [vmem:[%s1668_s1 + $0x78] sm:$0xff]  ;;  %v541_v36 = vld [vmem:[%s1670_s3] sm:$0xff]  ;;  %v547_v37 = vld [vmem:[%s1670_s3 + $0x30] sm:$0xff] }
  0x13   : > { %1079 = vmatprep.mubr.f32.mxu1 %v547_v37 }
  0x14   : > { %1096 = vmatprep.subr.msk.bf16.mxu0 %vm1095_vm3, %v1094_v5  ;;  %295 = vperm.xlu0 %1174, %v253_v15  }
  0x15   : > { %1099 = vmatpush3.bf16.msk.msra.mxu0 %vm1095_vm3, %v1094_v5  ;;  %300 = vperm.xlu1 %1175, %v254_v16  }
  0x18   : > { %1015 = vmatmul.mubr.msk.f32.vlgmr.msra.gmra.mrb[0].mxu0 %vm343_vm0, %v232_v9  ;;  %305 = vperm.xlu0 %1174, %v255_v19  }
  0x19   : > { %1017 = vmatprep.mubr.msk.f32.mxu0 %vm343_vm0, %v233_v10  ;;  %310 = vperm.xlu1 %1175, %v256_v20  }
  0x1c   : > { %1018 = vmatmul.mubr.msk.f32.gmra.mrb[2].mxu0 %vm343_vm0, %v234_v13  ;;  %315 = vperm.xlu0 %1174, %v257_v23  }
  0x1d   : > { %1020 = vmatprep.mubr.msk.f32.mxu0 %vm343_vm0, %v235_v14  ;;  %320 = vperm.xlu1 %1175, %v258_v24  }
  0x20   : > { %1021 = vmatmul.mubr.msk.f32.gmra.mrb[4].mxu0 %vm343_vm0, %v236_v17  ;;  %325 = vperm.xlu0 %1174, %v259_v27  }
  0x21   : > { %1023 = vmatprep.mubr.msk.f32.mxu0 %vm343_vm0, %v237_v18  ;;  %330 = vperm.xlu1 %1175, %v260_v28  }
  0x24   : > { %1024 = vmatmul.mubr.msk.f32.gmra.mrb[6].mxu0 %vm343_vm0, %v238_v21  ;;  %335 = vperm.xlu0 %1174, %v261_v31  }
  0x25   : > { %1026 = vmatprep.mubr.msk.f32.mxu0 %vm343_vm0, %v239_v22  ;;  %340 = vperm.xlu1 %1175, %v262_v32  }
  0x28   : > { %1027 = vmatmul.mubr.msk.f32.gmra.mrb[8].mxu0 %vm343_vm0, %v240_v25 }
  0x29   : > { %1029 = vmatprep.mubr.msk.f32.mxu0 %vm343_vm0, %v241_v26 }
  0x2c   : > { %1030 = vmatmul.mubr.msk.f32.gmra.mrb[10].mxu0 %vm343_vm0, %v242_v29 }
  0x2d   : > { %1032 = vmatprep.mubr.msk.f32.mxu0 %vm343_vm0, %v243_v30 }
  0x30   : > { %1033 = vmatmul.mubr.msk.f32.gmra.mrb[12].mxu0 %vm343_vm0, %v244_v33 }
  0x31   : > { %1035 = vmatprep.mubr.msk.f32.mxu0 %vm343_vm0, %v245_v34 }
  0x34   : > { %1036 = vmatmul.mubr.msk.f32.gmra.mrb[14].mxu0 %vm343_vm0, %v246_v35 }
  0x35   : > { %1070 = vmatprep.mubr.f32.mxu0 %v541_v36 }
  0x87   : > { %v266_v39 = vpop.permute.xlu0 %265 }
  0x88   : > { %v276_v38 = vpop.permute.xlu1 %275 }
  0x8b   : > { %v271_v41 = vpop.permute.xlu0 %270 }
  0x8c   : > { %v281_v40 = vpop.permute.xlu1 %280 }
  0x8f   : > { %v286_v43 = vpop.permute.xlu0 %285 }
  0x90   : > { %v291_v42 = vpop.permute.xlu1 %290 }
  0x93   : > { %v296_v52 = vpop.permute.xlu0 %295 }
  0x94   : > { %v301_v49 = vpop.permute.xlu1 %300 }
  0x97   : > { %v306_v1 = vpop.permute.xlu0 %305 }
  0x98   : > { %v311_v62 = vpop.permute.xlu1 %310 }
  0x9b   : > { %v316_v13 = vpop.permute.xlu0 %315 }
  0x9c   : > { %v321_v10 = vpop.permute.xlu1 %320 }
  0x9f   : > { %v326_v26 = vpop.permute.xlu0 %325 }
  0xa0   : > { %v331_v23 = vpop.permute.xlu1 %330 }
  0xa4   : > { %v341_v35 = vpop.permute.xlu1 %340 }
  0xeb   : > { %v1016_v44 = vpop.f32.mrb[0].mxu0 }
  0xec   : > { %v1433_v45 = vadd.f32 %v1016_v44, %v271_v41  ;;  %v462_v46 = vpop.f32.mrb[1].mxu0 }
  0xed   : > { %v1435_v47 = vadd.f32 %v462_v46, %v266_v39 }
  0xee   : > { %v558_v48 = vmul.f32 %v1433_v45, %v1433_v45 }
  0xef   : > { %v557_v50 = vmul.f32 %v1435_v47, %v1435_v47  ;;  %v1019_v51 = vpop.f32.mrb[2].mxu0 }
  0xf0   : > { %v1441_v53 = vadd.f32 %v1019_v51, %v281_v40  ;;  %v472_v54 = vpop.f32.mrb[3].mxu0  ;;  %v549_v51 = vld [vmem:[%s1670_s3 + $0x40] sm:$0xff] }
  0xf1   : > { %v1100_v55 = vpack.c.bf16 %v558_v48, %v557_v50  ;;  %v1443_v56 = vadd.f32 %v472_v54, %v276_v38  ;;  %v336_v38 = vpop.permute.xlu0 %335  ;;  %v542_v48 = vld [vmem:[%s1670_s3 + $0x8] sm:$0xff]  ;;  %v543_v50 = vld [vmem:[%s1670_s3 + $0x10] sm:$0xff] }
  0xf2   : > { %v560_v57 = vmul.f32 %v1441_v53, %v1441_v53  ;;  %v550_v54 = vld [vmem:[%s1670_s3 + $0x48] sm:$0xff] }
  0xf3   : > { %v559_v58 = vmul.f32 %v1443_v56, %v1443_v56  ;;  %v1022_v59 = vpop.f32.mrb[4].mxu0  ;;  %1101 = vmatprep.subr.bf16.mxu0 %v1100_v55  ;;  %1132 = vmatprep.subr.bf16.mxu1 %v1100_v55 }
  0xf4   : > { %v1449_v60 = vadd.f32 %v1022_v59, %v291_v42  ;;  %v482_v61 = vpop.f32.mrb[5].mxu0  ;;  %1103 = vmatpush3.bf16.msra.mxu0 %v1100_v55  ;;  %1140 = vmatpush3.bf16.msra.mxu1 %v1100_v55  ;;  %v545_v55 = vld [vmem:[%s1670_s3 + $0x20] sm:$0xff]  ;;  %v552_v59 = vld [vmem:[%s1670_s3 + $0x58] sm:$0xff] }
  0xf5   : > { %v1104_v63 = vpack.c.bf16 %v560_v57, %v559_v58  ;;  %v1451_v0 = vadd.f32 %v482_v61, %v286_v43  ;;  %v551_v57 = vld [vmem:[%s1670_s3 + $0x50] sm:$0xff]  ;;  %v546_v58 = vld [vmem:[%s1670_s3 + $0x28] sm:$0xff]  ;;  %v553_v61 = vld [vmem:[%s1670_s3 + $0x60] sm:$0xff] }
  0xf6   : > { %v562_v2 = vmul.f32 %v1449_v60, %v1449_v60 }
  0xf7   : > { %v561_v3 = vmul.f32 %v1451_v0, %v1451_v0  ;;  %v1025_v4 = vpop.f32.mrb[6].mxu0  ;;  %1105 = vmatprep.subr.bf16.mxu0 %v1104_v63  ;;  %1133 = vmatprep.subr.bf16.mxu1 %v1104_v63 }
  0xf8   : > { %v1457_v5 = vadd.f32 %v1025_v4, %v301_v49  ;;  %v492_v6 = vpop.f32.mrb[7].mxu0  ;;  %1107 = vmatpush3.bf16.msra.mxu0 %v1104_v63  ;;  %1141 = vmatpush3.bf16.msra.mxu1 %v1104_v63  ;;  %v548_v49 = vld [vmem:[%s1670_s3 + $0x38] sm:$0xff]  ;;  %v555_v63 = vld [vmem:[%s1670_s3 + $0x70] sm:$0xff] }
  0xf9   : > { %v1108_v7 = vpack.c.bf16 %v562_v2, %v561_v3  ;;  %v1459_v8 = vadd.f32 %v492_v6, %v296_v52  ;;  %v544_v52 = vld [vmem:[%s1670_s3 + $0x18] sm:$0xff] }
  0xfa   : > { %v564_v9 = vmul.f32 %v1457_v5, %v1457_v5 }
  0xfb   : > { %v563_v11 = vmul.f32 %v1459_v8, %v1459_v8  ;;  %v1028_v12 = vpop.f32.mrb[8].mxu0  ;;  %1109 = vmatprep.subr.bf16.mxu0 %v1108_v7  ;;  %1134 = vmatprep.subr.bf16.mxu1 %v1108_v7 }
  0xfc   : > { %v1465_v14 = vadd.f32 %v1028_v12, %v311_v62  ;;  %v502_v15 = vpop.f32.mrb[9].mxu0  ;;  %1111 = vmatpush3.bf16.msra.mxu0 %v1108_v7  ;;  %1142 = vmatpush3.bf16.msra.mxu1 %v1108_v7  ;;  %v554_v62 = vld [vmem:[%s1670_s3 + $0x68] sm:$0xff] }
  0xfd   : > { %v1112_v16 = vpack.c.bf16 %v564_v9, %v563_v11  ;;  %v1467_v17 = vadd.f32 %v502_v15, %v306_v1  ;;  %v556_v1 = vld [vmem:[%s1670_s3 + $0x78] sm:$0xff] }
  0xfe   : > { %v566_v18 = vmul.f32 %v1465_v14, %v1465_v14 }
  0xff   : > { %v565_v19 = vmul.f32 %v1467_v17, %v1467_v17  ;;  %v1031_v20 = vpop.f32.mrb[10].mxu0  ;;  %1113 = vmatprep.subr.bf16.mxu0 %v1112_v16  ;;  %1135 = vmatprep.subr.bf16.mxu1 %v1112_v16 }
 0x100   : > { %v1473_v21 = vadd.f32 %v1031_v20, %v321_v10  ;;  %v512_v22 = vpop.f32.mrb[11].mxu0  ;;  %1115 = vmatpush3.bf16.msra.mxu0 %v1112_v16  ;;  %1143 = vmatpush3.bf16.msra.mxu1 %v1112_v16 }
 0x101   : > { %v1116_v24 = vpack.c.bf16 %v566_v18, %v565_v19  ;;  %v1475_v25 = vadd.f32 %v512_v22, %v316_v13 }
 0x102   : > { %v568_v27 = vmul.f32 %v1473_v21, %v1473_v21 }
 0x103   : > { %v567_v28 = vmul.f32 %v1475_v25, %v1475_v25  ;;  %v1034_v29 = vpop.f32.mrb[12].mxu0  ;;  %1117 = vmatprep.subr.bf16.mxu0 %v1116_v24  ;;  %1136 = vmatprep.subr.bf16.mxu1 %v1116_v24 }
 0x104   : > { %v1481_v30 = vadd.f32 %v1034_v29, %v331_v23  ;;  %v522_v31 = vpop.f32.mrb[13].mxu0  ;;  %1119 = vmatpush3.bf16.msra.mxu0 %v1116_v24  ;;  %1144 = vmatpush3.bf16.msra.mxu1 %v1116_v24 }
 0x105   : > { %v1120_v32 = vpack.c.bf16 %v568_v27, %v567_v28  ;;  %v1483_v33 = vadd.f32 %v522_v31, %v326_v26 }
 0x106   : > { %v570_v34 = vmul.f32 %v1481_v30, %v1481_v30 }
 0x107   : > { %v569_v36 = vmul.f32 %v1483_v33, %v1483_v33  ;;  %v1037_v37 = vpop.f32.mrb[14].mxu0  ;;  %1121 = vmatprep.subr.bf16.mxu0 %v1120_v32  ;;  %1137 = vmatprep.subr.bf16.mxu1 %v1120_v32 }
 0x108   : > { %v1489_v39 = vadd.f32 %v1037_v37, %v341_v35  ;;  %v532_v40 = vpop.f32.mrb[15].mxu0  ;;  %1123 = vmatpush3.bf16.msra.mxu0 %v1120_v32  ;;  %1145 = vmatpush3.bf16.msra.mxu1 %v1120_v32 }
 0x109   : > { %v1124_v41 = vpack.c.bf16 %v570_v34, %v569_v36  ;;  %v1491_v42 = vadd.f32 %v532_v40, %v336_v38 }
 0x10a   : > { %v572_v43 = vmul.f32 %v1489_v39, %v1489_v39 }
 0x10b   : > { %v571_v44 = vmul.f32 %v1491_v42, %v1491_v42  ;;  %1125 = vmatprep.subr.bf16.mxu0 %v1124_v41  ;;  %1138 = vmatprep.subr.bf16.mxu1 %v1124_v41 }
 0x10c   : > { %1127 = vmatpush3.bf16.msra.mxu0 %v1124_v41  ;;  %1146 = vmatpush3.bf16.msra.mxu1 %v1124_v41 }
 0x10d   : > { %v1128_v46 = vpack.c.bf16 %v572_v43, %v571_v44 }
 0x10f   : > { %1129 = vmatprep.subr.bf16.mxu0 %v1128_v46  ;;  %1139 = vmatprep.subr.bf16.mxu1 %v1128_v46 }
 0x110   : > { %1131 = vmatpush3.bf16.msra.mxu0 %v1128_v46  ;;  %1147 = vmatpush3.bf16.msra.mxu1 %v1128_v46 }
 0x113   : > { %1071 = vmatmul.mubr.f32.vlgmr.msra.gmra.mrb[16].mxu0 %v542_v48  ;;  %1080 = vmatmul.mubr.f32.vlgmr.msra.gmra.mrb[0].mxu1 %v548_v49 }
 0x114   : > { %1073 = vmatprep.mubr.f32.mxu0 %v543_v50  ;;  %1082 = vmatprep.mubr.f32.mxu1 %v549_v51 }
 0x117   : > { %1074 = vmatmul.mubr.f32.gmra.mrb[18].mxu0 %v544_v52  ;;  %1083 = vmatmul.mubr.f32.gmra.mrb[2].mxu1 %v550_v54 }
 0x118   : > { %1076 = vmatprep.mubr.f32.mxu0 %v545_v55  ;;  %1085 = vmatprep.mubr.f32.mxu1 %v551_v57 }
 0x11b   : > { %1077 = vmatmul.mubr.f32.gmra.mrb[20].mxu0 %v546_v58  ;;  %1086 = vmatmul.mubr.f32.gmra.mrb[4].mxu1 %v552_v59 }
 0x11c   : > { %1088 = vmatprep.mubr.f32.mxu1 %v553_v61 }
 0x11f   : > { %1089 = vmatmul.mubr.f32.gmra.mrb[6].mxu1 %v554_v62 }
 0x120   : > { %1091 = vmatprep.mubr.f32.mxu1 %v555_v63 }
 0x123   : > { %1092 = vmatmul.mubr.f32.gmra.mrb[8].mxu1 %v556_v1 }
 0x1e6   : > { %v1072_v2 = vpop.f32.mrb[16].mxu0  ;;  %v1081_v3 = vpop.f32.mrb[0].mxu1 }
 0x1e7   : > { %v719_v4 = vadd.f32 1.0, %v1072_v2  ;;  %v767_v6 = vadd.f32 1e-08, %v1072_v2  ;;  %v725_v7 = vadd.f32 1.0, %v1081_v3  ;;  %v773_v9 = vadd.f32 1e-08, %v1081_v3 }
 0x1e8   : > { %v639_v10 = vpop.f32.mrb[17].mxu0  ;;  %v1539_v11 = vpop.f32.mrb[1].mxu1 }
 0x1e9   : > { %1176 = vrcp.f32 %v719_v4  ;;  %v718_v12 = vadd.f32 1.0, %v639_v10  ;;  %v766_v13 = vadd.f32 1e-08, %v639_v10  ;;  %v724_v18 = vadd.f32 1.0, %v1539_v11 }
 0x1ea   : > { %1178 = vrsqrt.f32 %v767_v6  ;;  %v1541_v15 = vpop.f32.mrb[18].mxu0  ;;  %v1543_v16 = vpop.f32.mrb[2].mxu1  ;;  %v772_v22 = vadd.f32 1e-08, %v1539_v11 }
 0x1eb   : > { %1180 = vrcp.f32 %v725_v7  ;;  %v1546_v19 = vpop.f32.mrb[19].mxu0  ;;  %v1548_v20 = vpop.f32.mrb[3].mxu1  ;;  %v721_v23 = vadd.f32 1.0, %v1541_v15  ;;  %v769_v24 = vadd.f32 1e-08, %v1541_v15  ;;  %v727_v28 = vadd.f32 1.0, %v1543_v16 }
 0x1ec   : > { %1182 = vrsqrt.f32 %v773_v9  ;;  %v775_v32 = vadd.f32 1e-08, %v1543_v16  ;;  %v720_v34 = vadd.f32 1.0, %v1546_v19  ;;  %v768_v35 = vadd.f32 1e-08, %v1546_v19 }
 0x1ed   : > { %1184 = vrcp.f32 %v718_v12  ;;  %v726_v38 = vadd.f32 1.0, %v1548_v20  ;;  %v774_v44 = vadd.f32 1e-08, %v1548_v20 }
 0x1ee   : > { %1186 = vrsqrt.f32 %v766_v13  ;;  %v1553_v26 = vpop.f32.mrb[20].mxu0  ;;  %v1555_v27 = vpop.f32.mrb[4].mxu1 }
 0x1ef   : > { %1188 = vrcp.f32 %v724_v18  ;;  %v1558_v29 = vpop.f32.mrb[21].mxu0  ;;  %v1560_v31 = vpop.f32.mrb[5].mxu1  ;;  %v723_v48 = vadd.f32 1.0, %v1553_v26  ;;  %v771_v52 = vadd.f32 1e-08, %v1553_v26  ;;  %v729_v57 = vadd.f32 1.0, %v1555_v27 }
 0x1f0   : > { %1190 = vrsqrt.f32 %v772_v22  ;;  %v777_v58 = vadd.f32 1e-08, %v1555_v27  ;;  %v770_v4 = vadd.f32 1e-08, %v1558_v29  ;;  %v776_v13 = vadd.f32 1e-08, %v1560_v31 }
 0x1f1   : > { %1192 = vrcp.f32 %v721_v23 }
 0x1f2   : > { %1194 = vrsqrt.f32 %v769_v24  ;;  %v1565_v36 = vpop.f32.mrb[6].mxu1 }
 0x1f3   : > { %v1177_v37 = vpop.eup %1176  ;;  %1196 = vrcp.f32 %v727_v28  ;;  %v1568_v40 = vpop.f32.mrb[7].mxu1  ;;  %v779_v28 = vadd.f32 1e-08, %v1565_v36 }
 0x1f4   : > { %v1179_v41 = vpop.eup %1178  ;;  %v751_v43 = vmul.f32 %v1177_v37, %v1072_v2  ;;  %1198 = vrsqrt.f32 %v775_v32 }
 0x1f5   : > { %v1181_v46 = vpop.eup %1180  ;;  %1200 = vrcp.f32 %v720_v34 }
 0x1f6   : > { %v1183_v49 = vpop.eup %1182  ;;  %v799_v50 = vmul.f32 %v1179_v41, %v751_v43  ;;  %v757_v51 = vmul.f32 %v1181_v46, %v1081_v3  ;;  %1202 = vrsqrt.f32 %v768_v35  ;;  %v1574_v54 = vpop.f32.mrb[8].mxu1  ;;  %v722_v3 = vadd.f32 1.0, %v1558_v29 }
 0x1f7   : > { %v1185_v55 = vpop.eup %1184  ;;  %1204 = vrcp.f32 %v726_v38  ;;  %v1583_v59 = vpop.f32.mrb[9].mxu1  ;;  %v778_v38 = vadd.f32 1e-08, %v1568_v40 }
 0x1f8   : > { %v1187_v61 = vpop.eup %1186  ;;  %v815_v62 = vmul.f32 %v799_v50, %v1433_v45  ;;  %v805_v63 = vmul.f32 %v1183_v49, %v757_v51  ;;  %v750_v1 = vmul.f32 %v1185_v55, %v639_v10  ;;  %1206 = vrsqrt.f32 %v774_v44 }
 0x1f9   : > { %v1189_v2 = vpop.eup %1188  ;;  %1208 = vrcp.f32 %v723_v48  ;;  %v728_v10 = vadd.f32 1.0, %v1560_v31  ;;  %v781_v48 = vadd.f32 1e-08, %v1574_v54 }
 0x1fa   : > { %v1191_v6 = vpop.eup %1190  ;;  %832 = vst.msk [vmem:[%s1579_s15 + $0x8] sm:$0xff] %vm830_vm4, %v815_v62  ;;  %v821_v7 = vmul.f32 %v805_v63, %v1457_v5  ;;  %v798_v9 = vmul.f32 %v1187_v61, %v750_v1  ;;  %v756_v12 = vmul.f32 %v1189_v2, %v1539_v11  ;;  %1210 = vrsqrt.f32 %v771_v52 }
 0x1fb   : > { %v1193_v45 = vpop.eup %1192  ;;  %1212 = vrcp.f32 %v729_v57  ;;  %v731_v11 = vadd.f32 1.0, %v1565_v36  ;;  %v780_v62 = vadd.f32 1e-08, %v1583_v59 }
 0x1fc   : > { %v1195_v18 = vpop.eup %1194  ;;  %838 = vst.msk [vmem:[%s1579_s15 + $0x38] sm:$0xff] %vm830_vm4, %v821_v7  ;;  %v814_v22 = vmul.f32 %v798_v9, %v1435_v47  ;;  %v804_v23 = vmul.f32 %v1191_v6, %v756_v12  ;;  %v753_v24 = vmul.f32 %v1193_v45, %v1541_v15  ;;  %1214 = vrsqrt.f32 %v777_v58 }
 0x1fd   : > { %v1197_v5 = vpop.eup %1196  ;;  %1216 = vrcp.f32 %v722_v3  ;;  %v730_v15 = vadd.f32 1.0, %v1568_v40 }
 0x1fe   : > { %v1199_v32 = vpop.eup %1198  ;;  %831 = vst.msk [vmem:[%s1579_s15] sm:$0xff] %vm830_vm4, %v814_v22  ;;  %v820_v34 = vmul.f32 %v804_v23, %v1459_v8  ;;  %v801_v35 = vmul.f32 %v1195_v18, %v753_v24  ;;  %v759_v37 = vmul.f32 %v1197_v5, %v1543_v16  ;;  %1218 = vrsqrt.f32 %v770_v4 }
 0x1ff   : > { %v1201_v47 = vpop.eup %1200  ;;  %1220 = vrcp.f32 %v728_v10  ;;  %v733_v16 = vadd.f32 1.0, %v1574_v54 }
 0x200   : > { %v1203_v41 = vpop.eup %1202  ;;  %837 = vst.msk [vmem:[%s1579_s15 + $0x30] sm:$0xff] %vm830_vm4, %v820_v34  ;;  %v817_v43 = vmul.f32 %v801_v35, %v1441_v53  ;;  %v807_v44 = vmul.f32 %v1199_v32, %v759_v37  ;;  %v752_v46 = vmul.f32 %v1201_v47, %v1546_v19  ;;  %1222 = vrsqrt.f32 %v776_v13 }
 0x201   : > { %v1205_v8 = vpop.eup %1204  ;;  %1224 = vrcp.f32 %v731_v11  ;;  %v732_v19 = vadd.f32 1.0, %v1583_v59 }
 0x202   : > { %v1207_v49 = vpop.eup %1206  ;;  %834 = vst.msk [vmem:[%s1579_s15 + $0x18] sm:$0xff] %vm830_vm4, %v817_v43  ;;  %v823_v50 = vmul.f32 %v807_v44, %v1465_v14  ;;  %v800_v51 = vmul.f32 %v1203_v41, %v752_v46  ;;  %v758_v53 = vmul.f32 %v1205_v8, %v1548_v20  ;;  %1226 = vrsqrt.f32 %v779_v28 }
 0x203   : > { %v1209_v52 = vpop.eup %1208  ;;  %1228 = vrcp.f32 %v730_v15 }
 0x204   : > { %v1211_v55 = vpop.eup %1210  ;;  %840 = vst.msk [vmem:[%s1579_s15 + $0x48] sm:$0xff] %vm830_vm4, %v823_v50  ;;  %v816_v57 = vmul.f32 %v800_v51, %v1443_v56  ;;  %v806_v58 = vmul.f32 %v1207_v49, %v758_v53  ;;  %v755_v61 = vmul.f32 %v1209_v52, %v1553_v26  ;;  %1230 = vrsqrt.f32 %v778_v38 }
 0x205   : > { %v1213_v14 = vpop.eup %1212  ;;  %1232 = vrcp.f32 %v733_v16 }
 0x206   : > { %v1215_v20 = vpop.eup %1214  ;;  %833 = vst.msk [vmem:[%s1579_s15 + $0x10] sm:$0xff] %vm830_vm4, %v816_v57  ;;  %v822_v63 = vmul.f32 %v806_v58, %v1467_v17  ;;  %v803_v1 = vmul.f32 %v1211_v55, %v755_v61  ;;  %v761_v2 = vmul.f32 %v1213_v14, %v1555_v27  ;;  %1234 = vrsqrt.f32 %v781_v48 }
 0x207   : > { %v1217_v56 = vpop.eup %1216  ;;  %1236 = vrcp.f32 %v732_v19 }
 0x208   : > { %v1219_v3 = vpop.eup %1218  ;;  %839 = vst.msk [vmem:[%s1579_s15 + $0x40] sm:$0xff] %vm830_vm4, %v822_v63  ;;  %v819_v26 = vmul.f32 %v803_v1, %v1449_v60  ;;  %v809_v4 = vmul.f32 %v1215_v20, %v761_v2  ;;  %v754_v6 = vmul.f32 %v1217_v56, %v1558_v29  ;;  %1238 = vrsqrt.f32 %v780_v62 }
 0x209   : > { %v1221_v7 = vpop.eup %1220 }
 0x20a   : > { %v1223_v9 = vpop.eup %1222  ;;  %836 = vst.msk [vmem:[%s1579_s15 + $0x28] sm:$0xff] %vm830_vm4, %v819_v26  ;;  %v825_v17 = vmul.f32 %v809_v4, %v1473_v21  ;;  %v802_v27 = vmul.f32 %v1219_v3, %v754_v6  ;;  %v760_v12 = vmul.f32 %v1221_v7, %v1560_v31 }
 0x20b   : > { %v1225_v45 = vpop.eup %1224 }
 0x20c   : > { %v1227_v10 = vpop.eup %1226  ;;  %842 = vst.msk [vmem:[%s1579_s15 + $0x58] sm:$0xff] %vm830_vm4, %v825_v17  ;;  %v818_v60 = vmul.f32 %v802_v27, %v1451_v0  ;;  %v808_v29 = vmul.f32 %v1223_v9, %v760_v12  ;;  %v763_v13 = vmul.f32 %v1225_v45, %v1565_v36 }
 0x20d   : > { %v1229_v18 = vpop.eup %1228 }
 0x20e   : > { %v1231_v22 = vpop.eup %1230  ;;  %835 = vst.msk [vmem:[%s1579_s15 + $0x20] sm:$0xff] %vm830_vm4, %v818_v60  ;;  %v824_v21 = vmul.f32 %v808_v29, %v1475_v25  ;;  %v811_v23 = vmul.f32 %v1227_v10, %v763_v13  ;;  %v762_v31 = vmul.f32 %v1229_v18, %v1568_v40 }
 0x20f   : > { %v1233_v24 = vpop.eup %1232 }
 0x210   : > { %v1235_v5 = vpop.eup %1234  ;;  %841 = vst.msk [vmem:[%s1579_s15 + $0x50] sm:$0xff] %vm830_vm4, %v824_v21  ;;  %v827_v0 = vmul.f32 %v811_v23, %v1481_v30  ;;  %v810_v11 = vmul.f32 %v1231_v22, %v762_v31  ;;  %v765_v36 = vmul.f32 %v1233_v24, %v1574_v54 }
 0x211   : > { %v1237_v28 = vpop.eup %1236 }
 0x212   : > { %844 = vst.msk [vmem:[%s1579_s15 + $0x68] sm:$0xff] %vm830_vm4, %v827_v0  ;;  %v826_v32 = vmul.f32 %v810_v11, %v1483_v33  ;;  %v813_v25 = vmul.f32 %v1235_v5, %v765_v36  ;;  %v764_v34 = vmul.f32 %v1237_v28, %v1583_v59  ;;  %v1239_v40 = vpop.eup %1238 }
 0x214   : > { %843 = vst.msk [vmem:[%s1579_s15 + $0x60] sm:$0xff] %vm830_vm4, %v826_v32  ;;  %v829_v35 = vmul.f32 %v813_v25, %v1489_v39  ;;  %v812_v37 = vmul.f32 %v1239_v40, %v764_v34 }
 0x216   : > { %846 = vst.msk [vmem:[%s1579_s15 + $0x78] sm:$0xff] %vm830_vm4, %v829_v35  ;;  %v828_v30 = vmul.f32 %v812_v37, %v1491_v42 }
 0x218   : > { %845 = vst.msk [vmem:[%s1579_s15 + $0x70] sm:$0xff] %vm830_vm4, %v828_v30 }
 0x219 PF: > { %s14_s17 = sadd.s32 1, %s1262_s17   ;;  %s1672_s15 = smov %s1258_s16 }
 0x21a   : > { %p11_p5 = scmp.ge.s32.totalorder %s14_s17, 4   ;;  %s1673_s16 = smov %s1675_s18 }
 0x21c   :  { %13 = sbr.rel (!%p11_p5) target bundleno = 2 (0x2), region = 66 }

</bundles_post_ra>
